<compile_context>
chip_gen: v7x
topology: tpu7x:2x2x1
jax: 0.10.0
libtpu: 0.0.40
codegen_flags: <defaults>
</compile_context>

<pallas_src>
import jax
import jax.numpy as jnp
from jax.experimental import pallas as pl
from jax.experimental.pallas import tpu as pltpu


def lse_kernel(x_ref, w1_ref, w2_ref, o_ref):
    # x_ref: (tm, Dp)   w1_ref: (Dp, Dr)   w2_ref: (Dr, Dp)   o_ref: (tm, Dp)
    x = x_ref[...]                                   # native dtype (f32 / bf16)

    # fc[0] (Linear, no bias) + ReLU: MXU matmul with f32 accumulation, VPU relu.
    h = jnp.maximum(
        jnp.dot(x, w1_ref[...], preferred_element_type=jnp.float32), 0.0)

    # fc[2] (Linear, no bias) + Sigmoid (exp goes to the EUP slot).
    y = jax.nn.sigmoid(
        jnp.dot(h.astype(w2_ref.dtype), w2_ref[...],
                preferred_element_type=jnp.float32))

    # Residual: out = x + y.expand_as(x); single f32 copy of x, cast on store.
    o_ref[...] = (x.astype(jnp.float32) + y).astype(o_ref.dtype)


def lse_forward(x, w1, w2, *, tm=512):
    """x: (B, L, D); w1 == W1.T with shape (D, D//r); w2 == W2.T with shape (D//r, D)."""
    b, l, d = x.shape
    dr = w1.shape[1]
    m = b * l

    itemsize_x = jnp.dtype(x.dtype).itemsize
    itemsize_w = jnp.dtype(w1.dtype).itemsize

    # --- row tiling: large tiles, cdiv grid, zero-pad the ragged tail -------
    row_align = 16 if itemsize_x == 2 else 8          # sublane packing (bf16: 16)
    tm_eff = min(tm, pl.cdiv(m, row_align) * row_align)
    tm_eff = max(row_align, (tm_eff // row_align) * row_align)
    grid_m = pl.cdiv(m, tm_eff)
    m_pad = grid_m * tm_eff

    # --- lane-dense channel dim: pad D up to a multiple of 128 --------------
    d_pad = pl.cdiv(d, 128) * 128

    xf = x.reshape(m, d)
    if m_pad != m or d_pad != d:
        xf = jnp.pad(xf, ((0, m_pad - m), (0, d_pad - d)))
    w1p = jnp.pad(w1, ((0, d_pad - d), (0, 0))) if d_pad != d else w1
    w2p = jnp.pad(w2, ((0, 0), (0, d_pad - d))) if d_pad != d else w2

    # --- scheduler / compiler hints ------------------------------------------
    cost = pl.CostEstimate(
        flops=int(2 * 2 * m_pad * d_pad * dr + 2 * m_pad * d_pad),
        transcendentals=int(m_pad * d_pad),
        bytes_accessed=int(2 * m_pad * d_pad * itemsize_x
                           + 2 * d_pad * dr * itemsize_w),
    )
    tile_bytes = tm_eff * d_pad * itemsize_x
    w_bytes = 2 * d_pad * dr * itemsize_w
    scratch_f32 = 2 * tm_eff * (d_pad + dr) * 4       # in-kernel f32 intermediates
    needed = 2 * 2 * tile_bytes + 2 * w_bytes + scratch_f32
    vmem_limit = int(min(max(2 * needed, 32 * 1024 * 1024), 50 * 1024 * 1024))

    out = pl.pallas_call(
        lse_kernel,
        out_shape=jax.ShapeDtypeStruct((m_pad, d_pad), x.dtype),
        grid_spec=pl.GridSpec(
            grid=(grid_m,),
            in_specs=[
                pl.BlockSpec((tm_eff, d_pad), lambda i: (i, 0)),   # x row tile
                pl.BlockSpec((d_pad, dr), lambda i: (0, 0)),       # W1^T (whole)
                pl.BlockSpec((dr, d_pad), lambda i: (0, 0)),       # W2^T (whole)
            ],
            out_specs=pl.BlockSpec((tm_eff, d_pad), lambda i: (i, 0)),
        ),
        input_output_aliases={0: 0},                   # reuse x's HBM buffer
        cost_estimate=cost,
        compiler_params=pltpu.CompilerParams(
            dimension_semantics=("parallel",),
            vmem_limit_bytes=vmem_limit,
        ),
    )(xf, w1p, w2p)

    return out[:m, :d].reshape(b, l, d)


def lse_reference(x, w1, w2):
    h = jnp.maximum(jnp.einsum("bld,dh->blh", x, w1), 0.0)
    y = jax.nn.sigmoid(jnp.einsum("blh,hd->bld", h, w2))
    return x + y


def _make_inputs(key, b, l, d, r, dtype=jnp.float32):
    dr = d // r
    kx, k1, k2 = jax.random.split(key, 3)
    x = jax.random.normal(kx, (b, l, d), dtype=dtype)
    # PyTorch Linear weight is (out, in); we store/use the transposed versions:
    # W1^T: (D, D//r), W2^T: (D//r, D).
    w1_t = ((jax.random.uniform(k1, (d, dr), dtype=jnp.float32) - 0.5)
            * (2.0 / jnp.sqrt(d))).astype(dtype)
    w2_t = ((jax.random.uniform(k2, (dr, d), dtype=jnp.float32) - 0.5)
            * (2.0 / jnp.sqrt(dr))).astype(dtype)
    return x, w1_t, w2_t


if __name__ == "__main__":
    key = jax.random.PRNGKey(0)
    k_a, k_b = jax.random.split(key)

    fwd = jax.jit(lse_forward)

    # Case 1: lane-dense channel dim (D = 128, reduction 16 -> Dr = 8).
    x, w1_t, w2_t = _make_inputs(k_a, 2, 8, 128, 16)
    out = fwd(x, w1_t, w2_t)
    jax.block_until_ready(out)
    ref = lse_reference(x, w1_t, w2_t)
    assert jnp.allclose(out, ref, atol=1e-5, rtol=1e-5), "mismatch vs reference (case 1)"

    # Case 2: ragged row count + sub-128 channel dim -> exercises cdiv + padding path.
    x2, w1_t2, w2_t2 = _make_inputs(k_b, 3, 7, 64, 16)
    out2 = fwd(x2, w1_t2, w2_t2)
    jax.block_until_ready(out2)
    ref2 = lse_reference(x2, w1_t2, w2_t2)
    assert jnp.allclose(out2, ref2, atol=1e-5, rtol=1e-5), "mismatch vs reference (case 2)"

    print("KERNEL_OK")
</pallas_src>

<mosaic_0001>
module attributes {stable_mosaic.version = 11 : i64} {
  func.func @lse_kernel(%arg0: i32, %arg1: memref<16x128xf32, #tpu.memory_space<vmem>>, %arg2: memref<128x8xf32, #tpu.memory_space<vmem>>, %arg3: memref<8x128xf32, #tpu.memory_space<vmem>>, %arg4: memref<16x128xf32, #tpu.memory_space<vmem>>) attributes {dimension_semantics = [#tpu.dimension_semantics<parallel>], iteration_bounds = array<i64: 1>, scalar_prefetch = 0 : i64, scratch_operands = 0 : i64, tpu.core_type = #tpu.core_type<tc>, window_params = [{transform_indices = @transform_0, window_bounds = array<i64: 16, 128>}, {pipeline_mode = #tpu.pipeline_mode<synchronous>, transform_indices = @transform_1, window_bounds = array<i64: 128, 8>}, {pipeline_mode = #tpu.pipeline_mode<synchronous>, transform_indices = @transform_2, window_bounds = array<i64: 8, 128>}, {transform_indices = @transform_3, window_bounds = array<i64: 16, 128>}]} {
    %c0 = arith.constant 0 : index
    %c0_0 = arith.constant 0 : index
    %0 = vector.load %arg1[%c0, %c0_0] : memref<16x128xf32, #tpu.memory_space<vmem>>, vector<16x128xf32>
    %c0_1 = arith.constant 0 : index
    %c0_2 = arith.constant 0 : index
    %1 = vector.load %arg2[%c0_1, %c0_2] : memref<128x8xf32, #tpu.memory_space<vmem>>, vector<128x8xf32>
    %cst = arith.constant dense<0.000000e+00> : vector<16x8xf32>
    %2 = tpu.matmul %0, %1, %cst {dimension_numbers = #tpu.dot_dimension_numbers<[1], [0], [0], [1], [0, 0, 1, 1], [], []>} : vector<16x128xf32>, vector<128x8xf32>, vector<16x8xf32> -> vector<16x8xf32>
    %cst_3 = arith.constant 0.000000e+00 : f32
    %3 = vector.broadcast %cst_3 : f32 to vector<16x8xf32>
    %4 = arith.maximumf %2, %3 : vector<16x8xf32>
    %c0_4 = arith.constant 0 : index
    %c0_5 = arith.constant 0 : index
    %5 = vector.load %arg3[%c0_4, %c0_5] : memref<8x128xf32, #tpu.memory_space<vmem>>, vector<8x128xf32>
    %cst_6 = arith.constant dense<0.000000e+00> : vector<16x128xf32>
    %6 = tpu.matmul %4, %5, %cst_6 {dimension_numbers = #tpu.dot_dimension_numbers<[1], [0], [0], [1], [0, 0, 1, 1], [], []>} : vector<16x8xf32>, vector<8x128xf32>, vector<16x128xf32> -> vector<16x128xf32>
    %7 = arith.negf %6 : vector<16x128xf32>
    %8 = math.exp %7 : vector<16x128xf32>
    %cst_7 = arith.constant 1.000000e+00 : f32
    %9 = vector.broadcast %cst_7 : f32 to vector<16x128xf32>
    %10 = arith.addf %9, %8 : vector<16x128xf32>
    %11 = arith.divf %9, %10 : vector<16x128xf32>
    %12 = arith.addf %0, %11 : vector<16x128xf32>
    %c0_8 = arith.constant 0 : index
    %c0_9 = arith.constant 0 : index
    %13 = vector.load %arg4[%c0_8, %c0_9] : memref<16x128xf32, #tpu.memory_space<vmem>>, vector<16x128xf32>
    tpu.vector_store %arg4[%c0_8, %c0_9], %12 {strides = array<i32>} : memref<16x128xf32, #tpu.memory_space<vmem>>, vector<16x128xf32>,
    return
  }
  func.func @transform_0(%arg0: i32) -> (i32, i32) {
    %c0_i32 = arith.constant 0 : i32
    %c0_i32_0 = arith.constant 0 : i32
    return %arg0, %c0_i32 : i32, i32
  }
  func.func @transform_1(%arg0: i32) -> (i32, i32) {
    %c0_i32 = arith.constant 0 : i32
    %c0_i32_0 = arith.constant 0 : i32
    %c0_i32_1 = arith.constant 0 : i32
    return %c0_i32, %c0_i32_0 : i32, i32
  }
  func.func @transform_2(%arg0: i32) -> (i32, i32) {
    %c0_i32 = arith.constant 0 : i32
    %c0_i32_0 = arith.constant 0 : i32
    %c0_i32_1 = arith.constant 0 : i32
    return %c0_i32, %c0_i32_0 : i32, i32
  }
  func.func @transform_3(%arg0: i32) -> (i32, i32) {
    %c0_i32 = arith.constant 0 : i32
    %c0_i32_0 = arith.constant 0 : i32
    return %arg0, %c0_i32 : i32, i32
  }
}

</mosaic_0001>

<bundles_post_ra>
// kernel: lse_forward.1
= control target key start
LH: loop header
LB: loop body
LE: loop exit
PB: predicated region body
PF: predicated region fallthrough
CT: control target
= control target key end

     0   :  { %vm110_vm0 = vcmask 64512   ;;  %s400_s1 = inlined_call_operand.vmem [shape: f32[128,8], index: 1, kind: input, shape index: {}]   ;;  %s401_s0 = inlined_call_operand.vmem [shape: f32[16,128], index: 0, kind: input, shape index: {}, may-alias: {0,3}]   ;;  %s402_s2 = inlined_call_operand.vmem [shape: f32[8,128], index: 2, kind: input, shape index: {}]   ;;  %s403_s3 = inlined_call_operand.vmem [shape: f32[16,128], index: 3, kind: output, shape index: {}, may-alias: {0,3}]  }
   0x1   :  { %v16_v0 = vld [vmem:[%s400_s1] sm:$0xff]  ;;  %v17_v1 = vld [vmem:[%s400_s1 + $0x8] sm:$0xff]  ;;  %v18_v2 = vld [vmem:[%s400_s1 + $0x10] sm:$0xff] }
   0x2   :  { %v277_v3 = vpack.c.bf16 %v17_v1, %v16_v0  ;;  %v19_v4 = vld [vmem:[%s400_s1 + $0x18] sm:$0xff]  ;;  %v20_v6 = vld [vmem:[%s400_s1 + $0x20] sm:$0xff]  ;;  %v21_v7 = vld [vmem:[%s400_s1 + $0x28] sm:$0xff] }
   0x3   :  { %v281_v5 = vpack.c.bf16 %v19_v4, %v18_v2  ;;  %v285_v8 = vpack.c.bf16 %v21_v7, %v20_v6  ;;  %v14_v9 = vld [vmem:[%s401_s0] sm:$0xff]  ;;  %v22_v10 = vld [vmem:[%s400_s1 + $0x30] sm:$0xff]  ;;  %v23_v11 = vld [vmem:[%s400_s1 + $0x38] sm:$0xff] }
   0x4   :  { %278 = vmatprep.subr.bf16.mxu0 %v277_v3  ;;  %269 = vmatprep.mubr.f32.mxu0 %v14_v9  ;;  %v289_v12 = vpack.c.bf16 %v23_v11, %v22_v10  ;;  %v24_v13 = vld [vmem:[%s400_s1 + $0x40] sm:$0xff]  ;;  %v25_v14 = vld [vmem:[%s400_s1 + $0x48] sm:$0xff]  ;;  %v26_v16 = vld [vmem:[%s400_s1 + $0x50] sm:$0xff] }
   0x5   :  { %280 = vmatpush3.bf16.msra.mxu0 %v277_v3  ;;  %v293_v15 = vpack.c.bf16 %v25_v14, %v24_v13  ;;  %v27_v17 = vld [vmem:[%s400_s1 + $0x58] sm:$0xff]  ;;  %v28_v19 = vld [vmem:[%s400_s1 + $0x60] sm:$0xff]  ;;  %v29_v20 = vld [vmem:[%s400_s1 + $0x68] sm:$0xff] }
   0x6   :  { %282 = vmatprep.subr.bf16.mxu0 %v281_v5  ;;  %v297_v18 = vpack.c.bf16 %v27_v17, %v26_v16  ;;  %v301_v21 = vpack.c.bf16 %v29_v20, %v28_v19  ;;  %v30_v22 = vld [vmem:[%s400_s1 + $0x70] sm:$0xff]  ;;  %v31_v23 = vld [vmem:[%s400_s1 + $0x78] sm:$0xff]  ;;  %v15_v25 = vld [vmem:[%s401_s0 + $0x8] sm:$0xff] }
   0x7   :  { %v305_v24 = vpack.c.bf16 %v31_v23, %v30_v22  ;;  %v109_v26 = vld [vmem:[%s402_s2] sm:$0xff] }
   0x8   :  { %272 = vmatprep.subr.mxu1 %v109_v26 }
   0x9   :  { %284 = vmatpush3.bf16.msra.mxu0 %v281_v5  ;;  %273 = vmatpush3.msra.mxu1 %v109_v26 }
   0xa   :  { %286 = vmatprep.subr.bf16.mxu0 %v285_v8 }
   0xd   :  { %288 = vmatpush3.bf16.msra.mxu0 %v285_v8 }
   0xe   :  { %290 = vmatprep.subr.bf16.mxu0 %v289_v12 }
  0x11   :  { %292 = vmatpush3.bf16.msra.mxu0 %v289_v12 }
  0x12   :  { %294 = vmatprep.subr.bf16.mxu0 %v293_v15 }
  0x15   :  { %296 = vmatpush3.bf16.msra.mxu0 %v293_v15 }
  0x16   :  { %298 = vmatprep.subr.bf16.mxu0 %v297_v18 }
  0x19   :  { %300 = vmatpush3.bf16.msra.mxu0 %v297_v18 }
  0x1a   :  { %302 = vmatprep.subr.bf16.mxu0 %v301_v21 }
  0x1d   :  { %304 = vmatpush3.bf16.msra.mxu0 %v301_v21 }
  0x1e   :  { %306 = vmatprep.subr.bf16.mxu0 %v305_v24 }
  0x21   :  { %308 = vmatpush3.bf16.msra.mxu0 %v305_v24 }
  0x24   :  { %270 = vmatmul.mubr.f32.vlgmr.msra.gmra.mrb[0].mxu0 %v15_v25 }
  0xf7   :  { %v271_v27 = vpop.f32.mrb[0].mxu0 }
  0xf8   :  { %v98_v28 = vpop.f32.mrb[1].mxu0  ;;  %v108_v30 = vmax.f32 %v271_v27, 0.0 }
  0xf9   :  { %v107_v29 = vmax.f32 %v98_v28, 0.0 }
  0xfb   :  { %274 = vmatprep.mubr.msk.f32.mxu1 %vm110_vm0, %v107_v29 }
  0xfc   :  { %275 = vmatmul.mubr.msk.f32.vlgmr.msra.gmra.mrb[0].mxu1 %vm110_vm0, %v108_v30 }
 0x1cf   :  { %v276_v31 = vpop.f32.mrb[0].mxu1 }
 0x1d0   :  { %v215_v32 = vmul.f32 -1.442695, %v276_v31  ;;  %v183_v33 = vpop.f32.mrb[1].mxu1 }
 0x1d1   :  { %v214_v34 = vmul.f32 -1.442695, %v183_v33 }
 0x1d2   :  { %309 = vpow2.f32 %v215_v32 }
 0x1d3   :  { %311 = vpow2.f32 %v214_v34 }
 0x1dc   :  { %v310_v35 = vpop.eup %309 }
 0x1dd   :  { %v312_v36 = vpop.eup %311  ;;  %v199_v37 = vadd.f32 1.0, %v310_v35 }
 0x1de   :  { %v198_v38 = vadd.f32 1.0, %v312_v36 }
 0x1df   :  { %313 = vrcp.f32 %v199_v37 }
 0x1e0   :  { %315 = vrcp.f32 %v198_v38 }
 0x1e9   :  { %v314_v39 = vpop.eup %313 }
 0x1ea   :  { %v316_v40 = vpop.eup %315  ;;  %v205_v41 = vadd.f32 %v314_v39, %v15_v25 }
 0x1eb   :  { %v204_v42 = vadd.f32 %v316_v40, %v14_v9 }
 0x1ec   :  { %207 = vst [vmem:[%s403_s3 + $0x8] sm:$0xff] %v205_v41 }
 0x1ed   :  { %206 = vst [vmem:[%s403_s3] sm:$0xff] %v204_v42 }

</bundles_post_ra>
